<compile_context>
chip_gen: v5e
topology: v5e:2x2
jax: 0.10.0
libtpu: 0.0.40
codegen_flags: <defaults>
</compile_context>

<pallas_src>
import jax
import jax.numpy as jnp
from jax import lax
from jax.experimental import pallas as pl
from jax.experimental.pallas import tpu as pltpu


def _round_up(x, m):
    return (x + m - 1) // m * m


def _vmem_capacity_bytes():
    try:
        return int(pltpu.get_tpu_info().vmem_capacity_bytes)
    except Exception:
        return 64 * 1024 * 1024  # conservative default (v7x per-TC VMEM)


def _vmem_bytes_per_step(bb, t, d, slp, tg, reuse_cross):
    # double-buffered IO blocks
    io = bb * (t * d * 4          # test reps
               + d * slp * 4      # support reps (transposed, f32)
               + slp * 4          # ||s||^2 row
               + slp * tg * 2     # bf16 target tile
               + tg * 4           # inv_cnt tile
               + t * tg * 4       # sim out tile
               + d * tg * 4)      # proto out tile
    scratch = bb * (t * slp * 2 + (t * slp * 4 if reuse_cross else 0))
    # dominant live temporaries: cross+dist (f32), hi/lo (bf16), sum_t, sim pieces
    tmp = bb * (2 * t * slp * 4 + 2 * d * slp * 2 + d * tg * 4 + 2 * t * tg * 4)
    return 2 * io + scratch + tmp


def _make_kernel(reuse_cross):
    def kernel(t_ref, supT_ref, s2_ref, tgt_ref, inv_ref,
               sim_ref, protot_ref, oh_sc, *opt_scratch):
        # t_ref:      (bb, T,  D)    f32   test reps, already averaged over S
        # supT_ref:   (bb, D,  SLp)  f32   flattened support reps, transposed
        # s2_ref:     (bb, 1,  SLp)  f32   ||support||^2  (1e30 on SL padding)
        # tgt_ref:    (bb, SLp, tg)  bf16  one-hot targets (padded rows are 0)
        # inv_ref:    (bb, 1,  tg)   f32   1 / (tag_count + 1e-4)
        # sim_ref:    (bb, T,  tg)   f32   output tile (lane-dense)
        # protot_ref: (bb, D,  tg)   f32   prototypes, transposed (lane-dense)
        # oh_sc:      (bb, T,  SLp)  bf16  NN one-hot, persists across tag steps
        # opt_scratch: optional (bb, T, SLp) f32 cross-product scratch
        slp = s2_ref.shape[2]
        g = pl.program_id(1)

        @pl.when(g == 0)
        def _():
            # nearest support token per query; f32 MXU pass so first-min
            # selection matches the reference (||t||^2 dropped: row-constant).
            cross = jnp.einsum('btd,bdk->btk', t_ref[...], supT_ref[...],
                               preferred_element_type=jnp.float32)   # (bb,T,SLp)
            dist = s2_ref[...] - 2.0 * cross
            min_d = jnp.min(dist, axis=-1, keepdims=True)            # (bb,T,1)
            col = lax.broadcasted_iota(jnp.int32, (1, 1, slp), 2)
            first = jnp.min(jnp.where(dist <= min_d, col, slp),
                            axis=-1, keepdims=True)                  # (bb,T,1)
            oh_sc[...] = (col == first).astype(jnp.bfloat16)
            if reuse_cross:
                opt_scratch[0][...] = cross

        tgt_bf = tgt_ref[...]                     # (bb, SLp, tg) exact {0,1}
        inv = inv_ref[...]                        # (bb, 1, tg)

        # NN "gather": bf16 x bf16 MXU pass, exact for one-hot operands.
        sim_nn = jnp.einsum('btk,bkg->btg', oh_sc[...], tgt_bf,
                            preferred_element_type=jnp.float32)      # (bb,T,tg)

        # prototypes via two bf16 MXU passes (hi/lo split), f32 accumulation.
        supT = supT_ref[...]
        hi = supT.astype(jnp.bfloat16)
        lo = (supT - hi.astype(jnp.float32)).astype(jnp.bfloat16)
        sum_t = (jnp.einsum('bdk,bkg->bdg', hi, tgt_bf,
                            preferred_element_type=jnp.float32)
                 + jnp.einsum('bdk,bkg->bdg', lo, tgt_bf,
                              preferred_element_type=jnp.float32))   # (bb,D,tg)
        protot = sum_t * inv
        protot_ref[...] = protot

        # reps_dot(test_mean, prototypes)
        if reuse_cross:
            # t . proto_g == (sum_k cross[t,k] * tgt[k,g]) * inv_cnt[g]
            qsum = jnp.einsum('btk,bkg->btg', opt_scratch[0][...], tgt_bf,
                              preferred_element_type=jnp.float32)
            sim_ref[...] = sim_nn + qsum * (0.5 * inv)
        else:
            sim1 = jnp.einsum('btd,bdg->btg', t_ref[...], protot,
                              preferred_element_type=jnp.float32)
            sim_ref[...] = sim_nn + 0.5 * sim1

    return kernel


def min_similarity_scorer(test_reps, support_reps, test_output_mask,
                          support_output_mask, support_targets,
                          label_reps=None, *, block_b=8):
    """Pallas forward of MinSimilarityScorer.

    test_reps:       (B, S, T, D) float32
    support_reps:    (B, S, L, D) float32
    support_targets: (B, S, L, G) one-hot
    masks / label_reps: accepted but unused (as in the reference forward).
    returns: (sim (B, T, G) float32, prototype_reps (B, G, D) float32)
    """
    del test_output_mask, support_output_mask, label_reps
    B, S, T, D = test_reps.shape
    L = support_reps.shape[2]
    G = support_targets.shape[3]
    SL = S * L
    SLp = _round_up(SL, 128)      # lane-dense support axis
    Gp = _round_up(G, 128)        # lane-dense tag axis

    # ---- wrapper-side layout work (cheap XLA; keeps the kernel DMA lean) ----
    t_mean = jnp.mean(test_reps.astype(jnp.float32), axis=1)             # (B,T,D)
    sup = support_reps.astype(jnp.float32).reshape(B, SL, D)             # (B,SL,D)
    s2 = jnp.sum(sup * sup, axis=-1)                                     # (B,SL)
    tgt_f = support_targets.reshape(B, SL, G).astype(jnp.float32)
    inv_cnt = 1.0 / (jnp.sum(tgt_f, axis=1) + 1e-4)                      # (B,G)

    supT = jnp.transpose(sup, (0, 2, 1))                                 # (B,D,SL)
    supT = jnp.pad(supT, ((0, 0), (0, 0), (0, SLp - SL)))
    # padded support columns must never win the argmin
    s2 = jnp.pad(s2, ((0, 0), (0, SLp - SL)), constant_values=1e30)[:, None, :]
    tgt = jnp.pad(tgt_f, ((0, 0), (0, SLp - SL), (0, Gp - G))).astype(jnp.bfloat16)
    inv = jnp.pad(inv_cnt, ((0, 0), (0, Gp - G)))[:, None, :]            # (B,1,Gp)

    # ---- generation-aware VMEM budget & tiling -----------------------------
    cap = _vmem_capacity_bytes()
    if cap >= 96 * 1024 * 1024:            # v5e / v6e: 128 MiB physical VMEM
        step_budget, limit_cap = 28 * 1024 * 1024, 96 * 1024 * 1024
    else:                                  # v7x: 64 MiB physical VMEM per TC
        step_budget, limit_cap = 16 * 1024 * 1024, 48 * 1024 * 1024

    reuse_cross = SLp <= D

    # batch tile: keep >=2 grid steps so both v7x TensorCores get work, then
    # shrink for VMEM; the tag tile shrinks as a last resort for large SL*G.
    bb = max(1, min(block_b, B, (B + 1) // 2))
    while bb > 1 and _vmem_bytes_per_step(bb, T, D, SLp, Gp, reuse_cross) > step_budget:
        bb = (bb + 1) // 2
    tg = Gp
    while tg > 128 and _vmem_bytes_per_step(bb, T, D, SLp, tg, reuse_cross) > step_budget:
        tg = _round_up(max(128, tg // 2), 128)
    Gp2 = _round_up(Gp, tg)
    if Gp2 != Gp:
        tgt = jnp.pad(tgt, ((0, 0), (0, 0), (0, Gp2 - Gp)))
        inv = jnp.pad(inv, ((0, 0), (0, 0), (0, Gp2 - Gp)))
    Bp = _round_up(B, bb)
    if Bp != B:
        pad = Bp - B
        t_mean = jnp.pad(t_mean, ((0, pad), (0, 0), (0, 0)))
        supT = jnp.pad(supT, ((0, pad), (0, 0), (0, 0)))
        s2 = jnp.pad(s2, ((0, pad), (0, 0), (0, 0)))
        tgt = jnp.pad(tgt, ((0, pad), (0, 0), (0, 0)))
        inv = jnp.pad(inv, ((0, pad), (0, 0), (0, 0)))
    grid = (Bp // bb, Gp2 // tg)

    flops_per_b = (2 * T * SLp * D                       # cross
                   + 2 * T * SLp * Gp2                   # NN gather
                   + 4 * D * SLp * Gp2                   # prototypes (2 bf16 passes)
                   + (2 * T * SLp * Gp2 if reuse_cross else 2 * T * D * Gp2))
    bytes_accessed = (t_mean.size * 4 + supT.size * 4 + s2.size * 4
                      + tgt.size * 2 + inv.size * 4
                      + Bp * T * Gp2 * 4 + Bp * D * Gp2 * 4)
    step_bytes = _vmem_bytes_per_step(bb, T, D, SLp, tg, reuse_cross)
    vmem_limit = int(min(limit_cap, max(32 * 1024 * 1024, 2 * step_bytes)))

    scratch = [pltpu.VMEM((bb, T, SLp), jnp.bfloat16)]
    if reuse_cross:
        scratch.append(pltpu.VMEM((bb, T, SLp), jnp.float32))

    sim_full, protot_full = pl.pallas_call(
        _make_kernel(reuse_cross),
        grid=grid,
        in_specs=[
            pl.BlockSpec((bb, T, D),    lambda i, g: (i, 0, 0)),
            pl.BlockSpec((bb, D, SLp),  lambda i, g: (i, 0, 0)),
            pl.BlockSpec((bb, 1, SLp),  lambda i, g: (i, 0, 0)),
            pl.BlockSpec((bb, SLp, tg), lambda i, g: (i, 0, g)),
            pl.BlockSpec((bb, 1, tg),   lambda i, g: (i, 0, g)),
        ],
        out_specs=[
            pl.BlockSpec((bb, T, tg), lambda i, g: (i, 0, g)),
            pl.BlockSpec((bb, D, tg), lambda i, g: (i, 0, g)),
        ],
        out_shape=[
            jax.ShapeDtypeStruct((Bp, T, Gp2), jnp.float32),
            jax.ShapeDtypeStruct((Bp, D, Gp2), jnp.float32),
        ],
        scratch_shapes=scratch,
        compiler_params=pltpu.CompilerParams(
            dimension_semantics=("parallel", "arbitrary"),
            vmem_limit_bytes=vmem_limit),
        cost_estimate=pl.CostEstimate(
            flops=Bp * flops_per_b, transcendentals=0,
            bytes_accessed=bytes_accessed),
    )(t_mean, supT, s2, tgt, inv)

    sim = sim_full[:B, :, :G]                                         # (B,T,G)
    proto = jnp.transpose(protot_full[:B, :, :G], (0, 2, 1))          # (B,G,D)
    # TODO(synk): when production D is a lane multiple and consumers want
    # (B, G, D), emit prototypes untransposed in-kernel to skip this transpose.
    return sim, proto


def _reference(test_reps, support_reps, support_targets):
    """Pure-JAX replica of the torch forward (for verification)."""
    B, S, T, D = test_reps.shape
    L = support_reps.shape[2]
    G = support_targets.shape[-1]
    t = jnp.mean(test_reps, axis=1)                                   # (B,T,D)
    sup_f = support_reps.reshape(B, S * L, D)
    tgt_f = support_targets.reshape(B, S * L, G).astype(jnp.float32)
    d = jnp.linalg.norm(t[:, :, None, :] - sup_f[:, None, :, :], axis=-1)
    idx = jnp.argmin(d, axis=-1)                                      # first min
    sim_nn = jnp.einsum('btk,bkg->btg', jax.nn.one_hot(idx, S * L), tgt_f)
    sum_reps = jnp.einsum('bkg,bkd->bgd', tgt_f, sup_f)               # (B,G,D)
    tag_count = jnp.sum(tgt_f, axis=1)[..., None] + 1e-4              # (B,G,1)
    proto = sum_reps / tag_count
    sim1 = jnp.einsum('btd,bgd->btg', t, proto)
    return sim_nn + 0.5 * sim1, proto


if __name__ == "__main__":
    # small deterministic shapes consistent with the module
    B, S, T, L, D, G = 2, 2, 8, 8, 32, 5

    key = jax.random.PRNGKey(0)
    k1, k2, k3 = jax.random.split(key, 3)

    test_reps = jax.random.normal(k1, (B, S, T, D), dtype=jnp.float32)
    support_reps = jax.random.normal(k2, (B, S, L, D), dtype=jnp.float32)
    labels = jax.random.randint(k3, (B, S, L), 0, G)
    support_targets = jax.nn.one_hot(labels, G, dtype=jnp.float32)
    # masks (unused by the reference forward, passed for API parity)
    test_output_mask = jnp.ones((B, T), dtype=jnp.float32)
    support_output_mask = jnp.ones((B, S, L), dtype=jnp.float32)

    sim, proto = min_similarity_scorer(test_reps, support_reps,
                                       test_output_mask, support_output_mask,
                                       support_targets)
    sim = jax.block_until_ready(sim)
    proto = jax.block_until_ready(proto)

    ref_sim, ref_proto = _reference(test_reps, support_reps, support_targets)
    assert sim.shape == (B, T, G) and proto.shape == (B, G, D)
    assert jnp.allclose(sim, ref_sim, atol=2e-4, rtol=2e-4), "sim mismatch"
    assert jnp.allclose(proto, ref_proto, atol=2e-4, rtol=2e-4), "proto mismatch"

    print("KERNEL_OK")
</pallas_src>

<mosaic_0001>
module attributes {stable_mosaic.version = 11 : i64} {
  func.func @kernel(%arg0: i32, %arg1: i32, %arg2: memref<1x8x32xf32, #tpu.memory_space<vmem>>, %arg3: memref<1x32x128xf32, #tpu.memory_space<vmem>>, %arg4: memref<1x1x128xf32, #tpu.memory_space<vmem>>, %arg5: memref<1x128x128xbf16, #tpu.memory_space<vmem>>, %arg6: memref<1x1x128xf32, #tpu.memory_space<vmem>>, %arg7: memref<1x8x128xf32, #tpu.memory_space<vmem>>, %arg8: memref<1x32x128xf32, #tpu.memory_space<vmem>>, %arg9: memref<1x8x128xbf16, #tpu.memory_space<vmem>>) attributes {dimension_semantics = [#tpu.dimension_semantics<parallel>, #tpu.dimension_semantics<arbitrary>], iteration_bounds = array<i64: 2, 1>, scalar_prefetch = 0 : i64, scratch_operands = 1 : i64, tpu.core_type = #tpu.core_type<tc>, window_params = [{transform_indices = @transform_0, window_bounds = array<i64: 1, 8, 32>}, {transform_indices = @transform_1, window_bounds = array<i64: 1, 32, 128>}, {transform_indices = @transform_2, window_bounds = array<i64: 1, 1, 128>}, {transform_indices = @transform_3, window_bounds = array<i64: 1, 128, 128>}, {transform_indices = @transform_4, window_bounds = array<i64: 1, 1, 128>}, {transform_indices = @transform_5, window_bounds = array<i64: 1, 8, 128>}, {transform_indices = @transform_6, window_bounds = array<i64: 1, 32, 128>}]} {
    %c0_i32 = arith.constant 0 : i32
    %0 = arith.cmpi eq, %arg1, %c0_i32 : i32
    %1 = arith.extui %0 : i1 to i32
    %c0_i32_0 = arith.constant 0 : i32
    %2 = arith.cmpi ne, %1, %c0_i32_0 : i32
    scf.if %2 {
      %c0_25 = arith.constant 0 : index
      %c0_26 = arith.constant 0 : index
      %c0_27 = arith.constant 0 : index
      %24 = vector.load %arg2[%c0_25, %c0_26, %c0_27] : memref<1x8x32xf32, #tpu.memory_space<vmem>>, vector<1x8x32xf32>
      %c0_28 = arith.constant 0 : index
      %c0_29 = arith.constant 0 : index
      %c0_30 = arith.constant 0 : index
      %25 = vector.load %arg3[%c0_28, %c0_29, %c0_30] : memref<1x32x128xf32, #tpu.memory_space<vmem>>, vector<1x32x128xf32>
      "tpu.trace_start"() <{level = 10 : i32, message = "btd,bdk->btk"}> : () -> ()
      %cst_31 = arith.constant dense<0.000000e+00> : vector<1x8x128xf32>
      %26 = tpu.matmul %24, %25, %cst_31 {dimension_numbers = #tpu.dot_dimension_numbers<[2], [1], [1], [2], [0, 0, 0, 1, 1, 2], [0], [0]>} : vector<1x8x32xf32>, vector<1x32x128xf32>, vector<1x8x128xf32> -> vector<1x8x128xf32>
      "tpu.trace_stop"() : () -> ()
      %c0_32 = arith.constant 0 : index
      %c0_33 = arith.constant 0 : index
      %c0_34 = arith.constant 0 : index
      %27 = vector.load %arg4[%c0_32, %c0_33, %c0_34] : memref<1x1x128xf32, #tpu.memory_space<vmem>>, vector<1x1x128xf32>
      %cst_35 = arith.constant 2.000000e+00 : f32
      %28 = vector.broadcast %cst_35 : f32 to vector<1x8x128xf32>
      %29 = arith.mulf %28, %26 : vector<1x8x128xf32>
      %30 = vector.broadcast %27 : vector<1x1x128xf32> to vector<1x8x128xf32>
      %31 = arith.subf %30, %29 : vector<1x8x128xf32>
      %cst_36 = arith.constant dense<0x7F800000> : vector<1x8xf32>
      %32 = vector.multi_reduction <minimumf>, %31, %cst_36 [2] : vector<1x8x128xf32> to vector<1x8xf32>
      %33 = vector.shape_cast %32 : vector<1x8xf32> to vector<1x8x1xf32>
      %34 = tpu.iota {dimensions = array<i32: 2>} : vector<1x1x128xi32>
      %35 = vector.broadcast %33 : vector<1x8x1xf32> to vector<1x8x128xf32>
      %36 = arith.cmpf ole, %31, %35 : vector<1x8x128xf32>
      %c128_i32 = arith.constant 128 : i32
      %37 = vector.shape_cast %34 : vector<1x1x128xi32> to vector<1x1x128xi32>
      %38 = vector.broadcast %37 : vector<1x1x128xi32> to vector<1x8x128xi32>
      %39 = vector.broadcast %c128_i32 : i32 to vector<1x8x128xi32>
      %40 = arith.select %36, %38, %39 : vector<1x8x128xi1>, vector<1x8x128xi32>
      %cst_37 = arith.constant dense<2147483647> : vector<1x8xi32>
      %41 = vector.multi_reduction <minsi>, %40, %cst_37 [2] : vector<1x8x128xi32> to vector<1x8xi32>
      %42 = vector.shape_cast %41 : vector<1x8xi32> to vector<1x8x1xi32>
      %43 = vector.broadcast %34 : vector<1x1x128xi32> to vector<1x8x128xi32>
      %44 = vector.broadcast %42 : vector<1x8x1xi32> to vector<1x8x128xi32>
      %45 = arith.cmpi eq, %43, %44 : vector<1x8x128xi32>
      %46 = arith.extui %45 : vector<1x8x128xi1> to vector<1x8x128xi32>
      %47 = arith.sitofp %46 : vector<1x8x128xi32> to vector<1x8x128xf32>
      %48 = arith.truncf %47 : vector<1x8x128xf32> to vector<1x8x128xbf16>
      %c0_38 = arith.constant 0 : index
      %c0_39 = arith.constant 0 : index
      %c0_40 = arith.constant 0 : index
      %49 = vector.load %arg9[%c0_38, %c0_39, %c0_40] : memref<1x8x128xbf16, #tpu.memory_space<vmem>>, vector<1x8x128xbf16>
      tpu.vector_store %arg9[%c0_38, %c0_39, %c0_40], %48 {strides = array<i32>} : memref<1x8x128xbf16, #tpu.memory_space<vmem>>, vector<1x8x128xbf16>,
    } else {
    }
    %c0 = arith.constant 0 : index
    %c0_1 = arith.constant 0 : index
    %c0_2 = arith.constant 0 : index
    %3 = vector.load %arg5[%c0, %c0_1, %c0_2] : memref<1x128x128xbf16, #tpu.memory_space<vmem>>, vector<1x128x128xbf16>
    %c0_3 = arith.constant 0 : index
    %c0_4 = arith.constant 0 : index
    %c0_5 = arith.constant 0 : index
    %4 = vector.load %arg6[%c0_3, %c0_4, %c0_5] : memref<1x1x128xf32, #tpu.memory_space<vmem>>, vector<1x1x128xf32>
    %c0_6 = arith.constant 0 : index
    %c0_7 = arith.constant 0 : index
    %c0_8 = arith.constant 0 : index
    %5 = vector.load %arg9[%c0_6, %c0_7, %c0_8] : memref<1x8x128xbf16, #tpu.memory_space<vmem>>, vector<1x8x128xbf16>
    "tpu.trace_start"() <{level = 10 : i32, message = "btk,bkg->btg"}> : () -> ()
    %cst = arith.constant dense<0.000000e+00> : vector<1x8x128xf32>
    %6 = tpu.matmul %5, %3, %cst {dimension_numbers = #tpu.dot_dimension_numbers<[2], [1], [1], [2], [0, 0, 0, 1, 1, 2], [0], [0]>} : vector<1x8x128xbf16>, vector<1x128x128xbf16>, vector<1x8x128xf32> -> vector<1x8x128xf32>
    "tpu.trace_stop"() : () -> ()
    %c0_9 = arith.constant 0 : index
    %c0_10 = arith.constant 0 : index
    %c0_11 = arith.constant 0 : index
    %7 = vector.load %arg3[%c0_9, %c0_10, %c0_11] : memref<1x32x128xf32, #tpu.memory_space<vmem>>, vector<1x32x128xf32>
    %8 = arith.truncf %7 : vector<1x32x128xf32> to vector<1x32x128xbf16>
    %9 = arith.extf %8 : vector<1x32x128xbf16> to vector<1x32x128xf32>
    %10 = arith.subf %7, %9 : vector<1x32x128xf32>
    %11 = arith.truncf %10 : vector<1x32x128xf32> to vector<1x32x128xbf16>
    "tpu.trace_start"() <{level = 10 : i32, message = "bdk,bkg->bdg"}> : () -> ()
    %cst_12 = arith.constant dense<0.000000e+00> : vector<1x32x128xf32>
    %12 = tpu.matmul %8, %3, %cst_12 {dimension_numbers = #tpu.dot_dimension_numbers<[2], [1], [1], [2], [0, 0, 0, 1, 1, 2], [0], [0]>} : vector<1x32x128xbf16>, vector<1x128x128xbf16>, vector<1x32x128xf32> -> vector<1x32x128xf32>
    %cst_13 = arith.constant dense<0.000000e+00> : vector<1x32x128xf32>
    %13 = tpu.matmul %11, %3, %cst_13 {dimension_numbers = #tpu.dot_dimension_numbers<[2], [1], [1], [2], [0, 0, 0, 1, 1, 2], [0], [0]>} : vector<1x32x128xbf16>, vector<1x128x128xbf16>, vector<1x32x128xf32> -> vector<1x32x128xf32>
    "tpu.trace_stop"() : () -> ()
    %14 = arith.addf %12, %13 : vector<1x32x128xf32>
    %15 = vector.broadcast %4 : vector<1x1x128xf32> to vector<1x32x128xf32>
    %16 = arith.mulf %14, %15 : vector<1x32x128xf32>
    %c0_14 = arith.constant 0 : index
    %c0_15 = arith.constant 0 : index
    %c0_16 = arith.constant 0 : index
    %17 = vector.load %arg8[%c0_14, %c0_15, %c0_16] : memref<1x32x128xf32, #tpu.memory_space<vmem>>, vector<1x32x128xf32>
    tpu.vector_store %arg8[%c0_14, %c0_15, %c0_16], %16 {strides = array<i32>} : memref<1x32x128xf32, #tpu.memory_space<vmem>>, vector<1x32x128xf32>,
    %c0_17 = arith.constant 0 : index
    %c0_18 = arith.constant 0 : index
    %c0_19 = arith.constant 0 : index
    %18 = vector.load %arg2[%c0_17, %c0_18, %c0_19] : memref<1x8x32xf32, #tpu.memory_space<vmem>>, vector<1x8x32xf32>
    "tpu.trace_start"() <{level = 10 : i32, message = "btd,bdg->btg"}> : () -> ()
    %cst_20 = arith.constant dense<0.000000e+00> : vector<1x8x128xf32>
    %19 = tpu.matmul %18, %16, %cst_20 {dimension_numbers = #tpu.dot_dimension_numbers<[2], [1], [1], [2], [0, 0, 0, 1, 1, 2], [0], [0]>} : vector<1x8x32xf32>, vector<1x32x128xf32>, vector<1x8x128xf32> -> vector<1x8x128xf32>
    "tpu.trace_stop"() : () -> ()
    %cst_21 = arith.constant 5.000000e-01 : f32
    %20 = vector.broadcast %cst_21 : f32 to vector<1x8x128xf32>
    %21 = arith.mulf %20, %19 : vector<1x8x128xf32>
    %22 = arith.addf %6, %21 : vector<1x8x128xf32>
    %c0_22 = arith.constant 0 : index
    %c0_23 = arith.constant 0 : index
    %c0_24 = arith.constant 0 : index
    %23 = vector.load %arg7[%c0_22, %c0_23, %c0_24] : memref<1x8x128xf32, #tpu.memory_space<vmem>>, vector<1x8x128xf32>
    tpu.vector_store %arg7[%c0_22, %c0_23, %c0_24], %22 {strides = array<i32>} : memref<1x8x128xf32, #tpu.memory_space<vmem>>, vector<1x8x128xf32>,
    return
  }
  func.func @transform_0(%arg0: i32, %arg1: i32) -> (i32, i32, i32) {
    %c0_i32 = arith.constant 0 : i32
    %c0_i32_0 = arith.constant 0 : i32
    %c0_i32_1 = arith.constant 0 : i32
    return %arg0, %c0_i32, %c0_i32_0 : i32, i32, i32
  }
  func.func @transform_1(%arg0: i32, %arg1: i32) -> (i32, i32, i32) {
    %c0_i32 = arith.constant 0 : i32
    %c0_i32_0 = arith.constant 0 : i32
    %c0_i32_1 = arith.constant 0 : i32
    return %arg0, %c0_i32, %c0_i32_0 : i32, i32, i32
  }
  func.func @transform_2(%arg0: i32, %arg1: i32) -> (i32, i32, i32) {
    %c0_i32 = arith.constant 0 : i32
    %c0_i32_0 = arith.constant 0 : i32
    %c0_i32_1 = arith.constant 0 : i32
    return %arg0, %c0_i32, %c0_i32_0 : i32, i32, i32
  }
  func.func @transform_3(%arg0: i32, %arg1: i32) -> (i32, i32, i32) {
    %c0_i32 = arith.constant 0 : i32
    %c0_i32_0 = arith.constant 0 : i32
    return %arg0, %c0_i32, %arg1 : i32, i32, i32
  }
  func.func @transform_4(%arg0: i32, %arg1: i32) -> (i32, i32, i32) {
    %c0_i32 = arith.constant 0 : i32
    %c0_i32_0 = arith.constant 0 : i32
    return %arg0, %c0_i32, %arg1 : i32, i32, i32
  }
  func.func @transform_5(%arg0: i32, %arg1: i32) -> (i32, i32, i32) {
    %c0_i32 = arith.constant 0 : i32
    %c0_i32_0 = arith.constant 0 : i32
    return %arg0, %c0_i32, %arg1 : i32, i32, i32
  }
  func.func @transform_6(%arg0: i32, %arg1: i32) -> (i32, i32, i32) {
    %c0_i32 = arith.constant 0 : i32
    %c0_i32_0 = arith.constant 0 : i32
    return %arg0, %c0_i32, %arg1 : i32, i32, i32
  }
}

</mosaic_0001>

<bundles_post_ra>
// kernel: tpu_custom_call.1
= control target key start
LH: loop header
LB: loop body
LE: loop exit
PB: predicated region body
PF: predicated region fallthrough
CT: control target
= control target key end

     0   :  { %s1632_s0 = inlined_call_operand.hbm [shape: f32[2,8,32], index: 0, kind: input, shape index: {}]   ;;  %s1633_s1 = inlined_call_operand.hbm [shape: f32[2,32,128], index: 1, kind: input, shape index: {}]   ;;  %s1634_s2 = inlined_call_operand.hbm [shape: f32[2,1,128], index: 2, kind: input, shape index: {}]   ;;  %s1635_s3 = inlined_call_operand.hbm [shape: bf16[2,128,128], index: 3, kind: input, shape index: {}]   ;;  %s1636_s4 = inlined_call_operand.vmem [shape: f32[2,1,128], index: 4, kind: input, shape index: {}]   ;;  %s1637_s5 = inlined_call_operand.hbm [shape: f32[2,8,128], index: 5, kind: output, shape index: {0}]   ;;  %s1638_s6 = inlined_call_operand.hbm [shape: f32[2,32,128], index: 6, kind: output, shape index: {1}]  }
   0x1   :  { %1644 = sst [smem:[#allocation24_spill]] %s1633_s1 }
   0x2   :  { %12 = vsyncpa [#allocation4], 0 }
   0x3   :  { %14 = vsyncpa [#allocation4 + $0x1], 0 }
   0x4   :  { %15 = vsyncpa [#allocation7], 0 }
   0x5   :  { %17 = vsyncpa [#allocation7 + $0x1], 0 }
   0x6   :  { %18 = vsyncpa [#allocation10], 0 }
   0x7   :  { %20 = vsyncpa [#allocation10 + $0x1], 0 }
   0x8   :  { %21 = vsyncpa [#allocation5], 0 }
   0x9   :  { %23 = vsyncpa [#allocation5 + $0x1], 0 }
   0xa   :  { %24 = vsyncpa [#allocation13], 0 }
   0xb   :  { %26 = vsyncpa [#allocation13 + $0x1], 0  ;;  %s1389_s21 = smov 0   ;;  %s1391_s22 = smov 0  }
   0xc   :  { %s1393_s23 = smov 0   ;;  %s1395_s24 = smov 0  }
   0xd   :  { %s1397_s25 = smov 0   ;;  %s1399_s26 = smov 0  }
   0xe LB: > { %1645 = sst [smem:[#allocation19_spill]] %s1333_s23  ;;  %s1420_s27 = sadd.s32 4294967295, %s1345_s26   ;;  %s1345_s26 = sphi %s1399_s26, %s32_s26   ;;  %s1341_s25 = sphi %s1397_s25, %s1665_s25   ;;  %s1337_s24 = sphi %s1395_s24, %s1664_s24   ;;  %s1333_s23 = sphi %s1393_s23, %s1660_s23   ;;  %s1329_s22 = sphi %s1391_s22, %s1663_s22   ;;  %s1325_s21 = sphi %s1389_s21, %s1662_s21  }
   0xf   : > { %1646 = sst [smem:[#allocation20_spill]] %s1345_s26  ;;  %s934_s28 = sadd.s32 4294967294, %s1345_s26  }
  0x10   : > { %s44_s29 = sadd.s32 1, %s1341_s25  ;;  %s51_s30 = sadd.s32 1, %s1333_s23 }
  0x11   : > { %p46_p0 = scmp.ge.s32.totalorder %s44_s29, 2  ;;  %p58_p1 = scmp.ne.s32.totalorder %s1333_s23, %s1329_s22 }
  0x12   : > { %p59_p2 = scmp.eq.s32.totalorder %s1345_s26, 0  ;;  %p64_p3 = scmp.ne.s32.totalorder %s1329_s22, %s1325_s21 }
  0x13   : > { %s1667_s29 = smov (%p46_p0, %s44_s29), 0  ;;  %p65_p5 = scmp.eq.s32.totalorder %s1420_s27, 0 }
  0x14   : > { %1647 = sst [smem:[#allocation21_spill]] %s1667_s29  ;;  %p1432_p4 = por %p59_p2, %p58_p1 }
  0x15   : > { %s48_s8 = ssub.s32 %s1341_s25, %s1667_s29  ;;  %p198_p6 = scmp.eq.s32.totalorder %s1420_s27, 1 }
  0x16   : > { %p49_p7 = scmp.eq.s32.totalorder %s48_s8, 0  ;;  %p1440_p8 = por %p65_p5, %p64_p3 }
  0x17   : > { %p1444_p9 = por %p198_p6, %p58_p1  ;;  %p204_p10 = scmp.eq.s32.totalorder %s934_s28, 1 }
  0x18   : > { %s1449_s11 = scalar_select %p49_p7, %s1333_s23, %s51_s30  }
  0x19   : > { %p1451_p11 = por %p204_p10, %p64_p3  ;;  %p936_p12 = scmp.ge.s32.totalorder %s1345_s26, 2 }
  0x1a   : > { %1651 = sst [smem:[#allocation22_spill]] %s1449_s11  ;;  %p1044_p13 = scmp.lt.s32.totalorder %s1345_s26, 2 }
  0x1b   : > { %s1652_s12 = scalar_select %p1451_p11, 1, 0 }
  0x1c   : > { %s1458_s13 = sand.u32 1, %s1333_s23   ;;  %s271_s14 = sand.u32 1, %s1345_s26  }
  0x1d   : > { %1653 = sst [smem:[#allocation23_spill]] %s1652_s12  ;;  %s939_s15 = sshll.u32 %s1458_s13, 5 }
  0x1e   : > { %p1464_p0 = pnand %p1044_p13, %p1432_p4  ;;  %s993_s17 = sshll.u32 %s1341_s25, 5 }
  0x1f   : > { %s1655_s1 = sld [smem:[#allocation24_spill]]  ;;  %s275_s30 = scalar_lea.vmem [#allocation6], %s939_s15 }
  0x20   : > { %s283_s8 = sshll.u32 %s275_s30, 4  ;;  %s272_s29 = scalar_lea.sflag [#allocation7], %s271_s14  ;;  %s284_s8 = int_to_ptr.vmem [resolvable:$true] %s283_s8 }
  0x21   : > { %s1347_s7 = smov 128   ;;  %s1348_s11 = smov 8  }
  0x22   : > { %p945_p1 = scmp.ge.s32.totalorder %s1345_s26, 1  ;;  %p340_p2 = scmp.lt.s32.totalorder %s1345_s26, 3 }
  0x23   : > { %s938_s15 = sshll.u32 %s1341_s25, 3  ;;  %s296_s12 = scalar_lea.vmem [#allocation8], %s1458_s13 }
  0x24   : > { %p1476_p3 = pnand %p945_p1, %p340_p2  ;;  %s260_s14 = scalar_lea.hbm %s1632_s0, %s938_s15 }
  0x25   : > { %s280_s20 = scalar_lea.hbm %s1655_s1, %s993_s17  ;;  %s937_s17 = sshll.u32 %s1458_s13, 3 }
  0x26   : > { %s281_s28 = sshll.u32 %s280_s20, 4  ;;  %s262_s20 = sshll.u32 %s260_s14, 4  ;;  %s282_s28 = int_to_ptr.hbm [resolvable:$true] %s281_s28  ;;  %s263_s20 = int_to_ptr.hbm [resolvable:$true] %s262_s20 }
  0x27   : > { %1030 = dma.hbm_to_vmem [thread:$0]  (!%p1464_p0), %s282_s28, 512, %s284_s8, %s272_s29, %s1347_s7, %s1347_s7, %s1348_s11  }
  0x28   : > { %s256_s30 = scalar_lea.vmem [#allocation3], %s937_s17  ;;  %s253_s11 = scalar_lea.sflag [#allocation4], %s1458_s13 }
  0x29   : > { %s264_s1 = sshll.u32 %s256_s30, 4  ;;  %s299_s7 = scalar_lea.hbm %s1634_s2, %s1341_s25  ;;  %s265_s1 = int_to_ptr.vmem [resolvable:$true] %s264_s1 }
  0x2a   : > { %1027 = dma.hbm_to_vmem [thread:$0]  (!%p1464_p0), %s263_s20, 128, %s265_s1, %s253_s11  }
  0x2b   : > { %s301_s26 = sshll.u32 %s299_s7, 4  ;;  %s303_s18 = sshll.u32 %s296_s12, 4  ;;  %s302_s26 = int_to_ptr.hbm [resolvable:$true] %s301_s26  ;;  %s304_s18 = int_to_ptr.vmem [resolvable:$true] %s303_s18 }
  0x2c   : > { %1033 = dma.hbm_to_vmem [thread:$0]  (!%p1464_p0), %s302_s26, 16, %s304_s18, %s272_s29  }
  0x2d   : > { %s942_s17 = sshll.u32 %s1458_s13, 6  ;;  %s994_s15 = sshll.u32 %s1341_s25, 6 }
  0x2e   : > { %s320_s30 = scalar_lea.hbm %s1635_s3, %s994_s15  ;;  %s314_s1 = scalar_lea.vmem [#allocation9], %s942_s17 }
  0x2f   : > { %s323_s20 = sshll.u32 %s314_s1, 4  ;;  %s321_s11 = sshll.u32 %s320_s30, 4  ;;  %s324_s20 = int_to_ptr.vmem [resolvable:$true] %s323_s20  ;;  %s322_s11 = int_to_ptr.hbm [resolvable:$true] %s321_s11 }
  0x30   : > { %s311_s28 = scalar_lea.sflag [#allocation10], %s1458_s13  ;;  %s1349_s8 = smov 64  }
  0x31   : > { %s1350_s7 = smov 4   ;;  %344 = sbr.rel (%p1476_p3) target bundleno = 705 (0x2c1), region = 40 }
  0x32   : > { %1036 = dma.hbm_to_vmem [thread:$0]  (!%p1464_p0), %s322_s11, 1024, %s324_s20, %s311_s28, %s1349_s8, %s1349_s8, %s1350_s7  }
  0x33   : > { %s1506_s26 = sand.u32 (!%p1476_p3), 1, %s1329_s22  }
  0x34   : > { %s946_s29 = sshll.u32 (!%p1476_p3), %s1506_s26, 3  ;;  %s347_s12 = scalar_lea.sflag (!%p1476_p3), [#allocation4], %s1506_s26 }
  0x35   : > { %s350_s18 = scalar_lea.vmem (!%p1476_p3), [#allocation3], %s946_s29 }
  0x36   : > { %1304 = dma.done.wait (%p1440_p8), %s347_s12, 128  }
  0x37   : > { %1306 = vsyncadd (%p1440_p8), %s347_s12, 4294967168  ;;  %s356_s23 = sand.u32 1, %s1420_s27   ;;  %s947_s13 = sshll.u32 %s1506_s26, 5 }
  0x38   : > { %s357_s16 = scalar_lea.sflag [#allocation7], %s356_s23  ;;  %s360_s17 = scalar_lea.vmem [#allocation6], %s947_s13 }
  0x39   : > { %1308 = dma.done.wait (%p1440_p8), %s357_s16, 528  }
  0x3a   : > { %1310 = vsyncadd (%p1440_p8), %s357_s16, 4294966768  ;;  %s948_s15 = sshll.u32 %s1506_s26, 6  ;;  %s369_s19 = scalar_lea.vmem [#allocation8], %s1506_s26 }
  0x3b   : > { %s376_s14 = scalar_lea.sflag [#allocation10], %s1506_s26  ;;  %s1527_s30 = scalar_lea.vmem [#allocation9], %s948_s15 }
  0x3c   : > { %1312 = dma.done.wait (%p1440_p8), %s376_s14, 1024  }
  0x3d   : > { %1314 = vsyncadd (%p1440_p8), %s376_s14, 4294966272  ;;  %v448_v0 = vld [vmem:[%s360_s17 + $0x18] sm:$0xff]  ;;  %v447_v1 = vld [vmem:[%s360_s17 + $0x10] sm:$0xff]  ;;  %vm449_vm0 = vcmask 261120   ;;  %v481_v25 = vlaneseq  ;;  %p434_p4 = scmp.lt.s32.totalorder %s1337_s24, 1  ;;  %s1567_s11 = scalar_lea.vmem [#allocation12], %s947_s13 }
  0x3e   : > { %465 = vmatpush.msra.mxu0 %v448_v0  ;;  %v446_v2 = vld [vmem:[%s360_s17 + $0x8] sm:$0xff]  ;;  %v445_v3 = vld [vmem:[%s360_s17] sm:$0xff]  ;;  %v1533_v4 = vld [vmem:[%s350_s18] sm:$0xff]  ;;  %v1543_v12 = vpack.c.bf16 %v447_v1, %v447_v1  ;;  %v1545_v13 = vpack.c.bf16 %v448_v0, %v448_v0  ;;  %s1003_s28 = sshll.u32 %s1337_s24, 5  ;;  %s737_s8 = sshll.u32 %s1567_s11, 4  ;;  %s738_s8 = int_to_ptr.vmem [resolvable:$true] %s737_s8 }
  0x3f   : > { %v1101_v5 = vld [vmem:[%s369_s19] ss:$0 sm:$0xff]  ;;  %v1002_v9 = vld [vmem:[%s1527_s30 + $0x38] sm:$0xff]  ;;  %v1001_v10 = vld [vmem:[%s1527_s30 + $0x30] sm:$0xff]  ;;  %v526_v18 = vpack.c.bf16 %v445_v3, %v445_v3  ;;  %v527_v19 = vpack.c.bf16 %v446_v2, %v446_v2  ;;  %v1553_v33 = vand.u32 127, %v481_v25  ;;  %s435_s27 = scalar_select %p434_p4, %s1337_s24, 1 }
  0x40   : > { %466 = vmatpush.msra.mxu0 %v447_v1  ;;  %633 = vmatpush.bf16.msra.mxu2 %v1002_v9  ;;  %v1000_v11 = vld [vmem:[%s1527_s30 + $0x28] sm:$0xff]  ;;  %v999_v14 = vld [vmem:[%s1527_s30 + $0x20] sm:$0xff]  ;;  %v532_v15 = vunpack.c.l.bf16 %v1543_v12  ;;  %v533_v16 = vunpack.c.l.bf16 %v1545_v13  ;;  %v998_v17 = vld [vmem:[%s1527_s30 + $0x18] sm:$0xff]  ;;  %v627_v48 = vunpack.c.l.b16 %v1543_v12  ;;  %v628_v49 = vunpack.c.l.b16 %v1545_v13  ;;  %s736_s18 = scalar_lea.hbm %s1638_s6, %s1003_s28  ;;  %s709_s13 = scalar_lea.sflag [#allocation13], %s1506_s26 }
  0x41   : > { %1004 = vmatpush.bf16.msra.mxu3 %v1002_v9  ;;  %602 = vmatpush.bf16.msra.mxu1 %v1002_v9  ;;  %v530_v22 = vunpack.c.l.bf16 %v526_v18  ;;  %v531_v23 = vunpack.c.l.bf16 %v527_v19  ;;  %v997_v24 = vld [vmem:[%s1527_s30 + $0x10] sm:$0xff]  ;;  %v996_v30 = vld [vmem:[%s1527_s30 + $0x8] sm:$0xff]  ;;  %v625_v35 = vunpack.c.l.b16 %v526_v18  ;;  %v626_v36 = vunpack.c.l.b16 %v527_v19  ;;  %v995_v39 = vld [vmem:[%s1527_s30] sm:$0xff]  ;;  %s439_s20 = scalar_lea.vmem %s1636_s4, %s435_s27  ;;  %s739_s23 = sshll.u32 %s736_s18, 4  ;;  %s740_s23 = int_to_ptr.hbm [resolvable:$true] %s739_s23 }
  0x42   : > { %467 = vmatpush.msra.mxu0 %v446_v2  ;;  %v536_v20 = vsub.f32 %v447_v1, %v532_v15  ;;  %v537_v21 = vsub.f32 %v448_v0, %v533_v16  ;;  %v630_v50 = vpack.c.b16 %v628_v49, %v627_v48  ;;  %v1102_v58 = vld [vmem:[%s439_s20] ss:$0 sm:$0xff]  ;;  %s1237_s16 = sshra.s32 %s740_s23, 4  ;;  %s1243_s14 = scalar_lea.hbm %s1638_s6, 64  ;;  %s1238_s16 = int_to_ptr.hbm [resolvable:$true] %s1237_s16 }
  0x43   : > { %v534_v26 = vsub.f32 %v445_v3, %v530_v22  ;;  %v535_v27 = vsub.f32 %v446_v2, %v531_v23  ;;  %v629_v44 = vpack.c.b16 %v626_v36, %v625_v35  ;;  %s1239_s17 = scalar_lea.hbm %s1238_s16, 32  ;;  %p1244_p8 = scmp.lt.s32.totalorder %s1238_s16, %s1638_s6 }
  0x44   : > { %468 = vmatpush.msra.mxu0 %v445_v3  ;;  %634 = vmatpush.bf16.msra.mxu2 %v1001_v10  ;;  %v540_v28 = vpack.c.bf16 %v536_v20, %v536_v20  ;;  %v541_v29 = vpack.c.bf16 %v537_v21, %v537_v21  ;;  %p1240_p5 = scmp.ne.s32.totalorder %s1238_s16, %s1239_s17  ;;  %p1245_p10 = scmp.lt.s32.totalorder %s1243_s14, %s1239_s17 }
  0x45   : > { %951 = vmatmul.msk.f32.vlgmr.msra.gmra.mxu0 %vm449_vm0, %v1533_v4  ;;  %1005 = vmatpush.bf16.msra.mxu3 %v1001_v10  ;;  %v538_v31 = vpack.c.bf16 %v534_v26, %v534_v26  ;;  %v539_v32 = vpack.c.bf16 %v535_v27, %v535_v27 }
  0x46   : > { %689 = vmatpush.bf16.msrb.mxu0 %v1002_v9  ;;  %603 = vmatpush.bf16.msra.mxu1 %v1001_v10  ;;  %v548_v37 = vunpack.c.l.b16 %v540_v28  ;;  %v549_v38 = vunpack.c.l.b16 %v541_v29  ;;  %p1241_p6 = pnand %p1240_p5, %p1444_p9  ;;  %p1246_p13 = por %p1245_p10, %p1244_p8 }
  0x47   : > { %v546_v40 = vunpack.c.l.b16 %v538_v31  ;;  %v547_v41 = vunpack.c.l.b16 %v539_v32 }
  0x48   : > { %635 = vmatpush.bf16.msra.mxu2 %v1000_v11  ;;  %v551_v45 = vpack.c.b16 %v549_v38, %v548_v37  ;;  %p1242_p7 = pneg %p1241_p6 }
  0x49   : > { %1006 = vmatpush.bf16.msra.mxu3 %v1000_v11  ;;  %v550_v47 = vpack.c.b16 %v547_v41, %v546_v40 }
  0x4a   : > { %690 = vmatpush.bf16.msrb.mxu0 %v1001_v10  ;;  %604 = vmatpush.bf16.msra.mxu1 %v1000_v11  ;;  %p1247_p0 = pnand %p1246_p13, %p1242_p7 }
  0x4c   : > { %636 = vmatpush.bf16.msra.mxu2 %v999_v14 }
  0x4d   : > { %1007 = vmatpush.bf16.msra.mxu3 %v999_v14 }
  0x4e   : > { %691 = vmatpush.bf16.msrb.mxu0 %v1000_v11  ;;  %605 = vmatpush.bf16.msra.mxu1 %v999_v14 }
  0x50   : > { %637 = vmatpush.bf16.msra.mxu2 %v998_v17 }
  0x51   : > { %1008 = vmatpush.bf16.msra.mxu3 %v998_v17 }
  0x52   : > { %692 = vmatpush.bf16.msrb.mxu0 %v999_v14  ;;  %606 = vmatpush.bf16.msra.mxu1 %v998_v17  ;;  %v1351_v14 = vmov 0.0  }
  0x54   : > { %638 = vmatpush.bf16.msra.mxu2 %v997_v24 }
  0x55   : > { %1009 = vmatpush.bf16.msra.mxu3 %v997_v24 }
  0x56   : > { %693 = vmatpush.bf16.msrb.mxu0 %v998_v17  ;;  %607 = vmatpush.bf16.msra.mxu1 %v997_v24 }
  0x58   : > { %639 = vmatpush.bf16.msra.mxu2 %v996_v30 }
  0x59   : > { %1010 = vmatpush.bf16.msra.mxu3 %v996_v30 }
  0x5a   : > { %694 = vmatpush.bf16.msrb.mxu0 %v997_v24  ;;  %608 = vmatpush.bf16.msra.mxu1 %v996_v30 }
  0x5c   : > { %640 = vmatpush.bf16.msra.mxu2 %v995_v39 }
  0x5d   : > { %1011 = vmatpush.bf16.msra.mxu3 %v995_v39 }
  0x5e   : > { %695 = vmatpush.bf16.msrb.mxu0 %v996_v30  ;;  %609 = vmatpush.bf16.msra.mxu1 %v995_v39 }
  0x5f   : > { %641 = vmatmul.bf16.vlgmr.msra.gmra.mxu2 %v629_v44 }
  0x60   : > { %615 = vmatmul.bf16.vlgmr.msra.gmra.mxu3 %v551_v45 }
  0x61   : > { %610 = vmatmul.bf16.vlgmr.msra.gmra.mxu1 %v550_v47 }
  0x62   : > { %696 = vmatpush.bf16.msrb.mxu0 %v995_v39 }
  0x6f   : > { %646 = vmatmul.bf16.gmra.mxu2 %v630_v50 }
  0xc2   : > { %v470_v6 = vpop.f32.mrf.mxu0 }
  0xc3   : > { %v474_v7 = vmul.f32 2.0, %v470_v6 }
  0xc5   : > { %v1537_v8 = vsub.f32 %v1101_v5, %v474_v7 }
  0xc7   : > { %479 = vmin.xlane.f32.xlu0 %v1537_v8 }
  0xde   : > { %v611_v55 = vpop.f32.mrf.mxu1 }
  0xe2   : > { %v642_v56 = vpop.f32.mrf.mxu2 }
  0xe3   : > { %v643_v57 = vadd.f32 %v642_v56, %v611_v55  ;;  %v616_v0 = vpop.f32.mrf.mxu3 }
  0xe5   : > { %v655_v59 = vmul.f32 %v1102_v58, %v643_v57 }
  0xe6   : > { %v613_v60 = vpop.f32.mrf.mxu1 }
  0xe7   : > { %659 = vst [vmem:[%s1567_s11] sm:$0xff] %v655_v59 }
  0xea   : > { %v644_v61 = vpop.f32.mrf.mxu2 }
  0xeb   : > { %v645_v62 = vadd.f32 %v644_v61, %v613_v60  ;;  %v618_v5 = vpop.f32.mrf.mxu3 }
  0xed   : > { %v656_v63 = vmul.f32 %v1102_v58, %v645_v62 }
  0xef   : > { %660 = vst [vmem:[%s1567_s11 + $0x8] sm:$0xff] %v656_v63 }
  0xf2   : > { %v647_v1 = vpop.f32.mrf.mxu2 }
  0xf3   : > { %v648_v2 = vadd.f32 %v647_v1, %v616_v0 }
  0xf5   : > { %v657_v3 = vmul.f32 %v1102_v58, %v648_v2 }
  0xf7   : > { %661 = vst [vmem:[%s1567_s11 + $0x10] sm:$0xff] %v657_v3 }
  0xfa   : > { %v649_v6 = vpop.f32.mrf.mxu2 }
  0xfb   : > { %v650_v7 = vadd.f32 %v649_v6, %v618_v5 }
 0x13a   : > { %v480_v34 = vpop.xlane.xlu0 %479 }
 0x13b   : > { %vm483_vm1 = vcmp.le.f32.partialorder %v1537_v8, %v480_v34  ;;  %v658_v8 = vmul.f32 %v1102_v58, %v650_v7 }
 0x13c   : > { %v484_v42 = vsel %vm483_vm1, %v1553_v33, 128 }
 0x13d   : > { %v486_v43 = vshra.s32 %v484_v42, 16  ;;  %v485_v51 = vand.u32 65535, %v484_v42  ;;  %662 = vst [vmem:[%s1567_s11 + $0x18] sm:$0xff] %v658_v8  ;;  %680 = vmatpush.msrb.mxu3 %v658_v8 }
 0x13f   : > { %v488_v46 = vcvt.s32.f32 %v486_v43  ;;  %v487_v53 = vcvt.s32.f32 %v485_v51  ;;  %681 = vmatpush.msrb.mxu3 %v657_v3 }
 0x141   : > { %489 = vmin.xlane.f32.xlu0 %v488_v46  ;;  %682 = vmatpush.msrb.mxu3 %v656_v63 }
 0x143   : > { %683 = vmatpush.msrb.mxu3 %v655_v59 }
 0x144   : > { %985 = vmatmul.msk.f32.vlgmr.msrb.gmra.mxu3 %vm449_vm0, %v1533_v4 }
 0x1b4   : > { %v490_v52 = vpop.xlane.xlu0 %489 }
 0x1b5   : > { %vm491_vm2 = vcmp.eq.f32.partialorder %v488_v46, %v490_v52  ;;  %v496_v9 = vcvt.f32.s32 %v490_v52 }
 0x1b6   : > { %v492_v54 = vsel %vm491_vm2, %v487_v53, inf }
 0x1b7   : > { %493 = vmin.xlane.f32.xlu1 %v492_v54  ;;  %v497_v11 = vshll.u32 %v496_v9, 16 }
 0x22a   : > { %v494_v10 = vpop.xlane.xlu1 %493 }
 0x22b   : > { %v495_v12 = vcvt.f32.s32 %v494_v10 }
 0x22d   : > { %v498_v13 = vadd.s32 %v497_v11, %v495_v12 }
 0x22f   : > { %vm499_vm3 = vcmp.eq.s32.totalorder %v1553_v33, %v498_v13 }
 0x230   : > { %v952_v15 = vsel %vm499_vm3, 1.0, %v1351_v14 }
 0x231   : > { %v502_v16 = vpack.c.bf16 %v952_v15, %v952_v15 }
 0x233   : > { %503 = vst [vmem:[#allocation2] sm:$0xf] %v502_v16 }
 0x23a   : > { %v521_v17 = vld [vmem:[#allocation2] sm:$0xf] }
 0x23b   : > { %697 = vmatmul.bf16.vlgmr.msrb.gmra.mxu0 %v521_v17 }
 0x23c   : > { %1250 = shalt.err (!%p1247_p0)
}
 0x23d   : > { %s1352_s9 = smov 128   ;;  %s1353_s1 = smov 8   ;;  %v685_v4 = vpop.f32.mrf.mxu3 }
 0x23e   : > { %1021 = dma.vmem_to_hbm [thread:$0]  (%p1444_p9), %s738_s8, 512, %s740_s23, %s709_s13, %s1352_s9, %s1352_s9, %s1353_s1   ;;  %v688_v18 = vmul.f32 0.5, %v685_v4 }
 0x23f   : > { %s988_s20 = sshll.u32 %s1337_s24, 3  ;;  %s426_s12 = scalar_lea.vmem [#allocation11], %s946_s29 }
 0x240   : > { %s720_s7 = scalar_lea.hbm %s1637_s5, %s988_s20  ;;  %s722_s18 = sshll.u32 %s426_s12, 4  ;;  %s723_s18 = int_to_ptr.vmem [resolvable:$true] %s722_s18 }
 0x241   : > { %s724_s16 = sshll.u32 %s720_s7, 4  ;;  %s704_s17 = scalar_lea.sflag [#allocation5], %s1506_s26  ;;  %s725_s16 = int_to_ptr.hbm [resolvable:$true] %s724_s16 }
 0x242   : > { %s1265_s15 = sshra.s32 %s725_s16, 4  ;;  %s1271_s13 = scalar_lea.hbm %s1637_s5, 16  ;;  %s1266_s15 = int_to_ptr.hbm [resolvable:$true] %s1265_s15 }
 0x243   : > { %s1267_s24 = scalar_lea.hbm %s1266_s15, 8  ;;  %p1272_p4 = scmp.lt.s32.totalorder %s1266_s15, %s1637_s5 }
 0x244   : > { %p1268_p1 = scmp.ne.s32.totalorder %s1266_s15, %s1267_s24  ;;  %p1273_p5 = scmp.lt.s32.totalorder %s1271_s13, %s1267_s24 }
 0x246   : > { %p1269_p2 = pnand %p1268_p1, %p1444_p9  ;;  %p1274_p6 = por %p1273_p5, %p1272_p4 }
 0x248   : > { %p1270_p3 = pneg %p1269_p2 }
 0x24a   : > { %p1275_p7 = pnand %p1274_p6, %p1270_p3 }
 0x2b8   : > { %v698_v19 = vpop.f32.mrf.mxu0 }
 0x2b9   : > { %v699_v20 = vadd.f32 %v698_v19, %v688_v18 }
 0x2bb   : > { %702 = vst [vmem:[%s426_s12] sm:$0xff] %v699_v20 }
 0x2bc   : > { %1278 = shalt.err (!%p1275_p7)
}
 0x2bd   : > { %1020 = dma.vmem_to_hbm [thread:$0]  (%p1444_p9), %s723_s18, 128, %s725_s16, %s704_s17  }
 0x2c0   : > { %v700_v21 = vpop.f32.mrf.mxu0 }
 0x2c1 PF: > { %s1658_s14 = sld [smem:[#allocation20_spill]]  ;;  %s754_s30 = sand.u32 1, %s1325_s21  }
 0x2c2   : > { %p1038_p8 = pnand %p936_p12, %p1451_p11  ;;  %s755_s27 = scalar_lea.sflag [#allocation5], %s754_s30 }
 0x2c4   : > { %p1039_p10 = pneg %p1038_p8 }
 0x2c6   : > { %1316 = dma.done.wait (%p1039_p10), %s755_s27, 128  }
 0x2c7   : > { %1318 = vsyncadd (%p1039_p10), %s755_s27, 4294967168  ;;  %s765_s9 = scalar_lea.sflag [#allocation13], %s754_s30 }
 0x2c8   : > { %1320 = dma.done.wait (%p1039_p10), %s765_s9, 512  }
 0x2c9   : > { %1322 = vsyncadd (%p1039_p10), %s765_s9, 4294966784  ;;  %s32_s26 = sadd.s32 1, %s1658_s14   ;;  %s1659_s10 = sld [smem:[#allocation19_spill]] }
 0x2ca   : > { %p29_p13 = scmp.ge.s32.totalorder %s32_s26, 4   ;;  %s1660_s23 = sld [smem:[#allocation22_spill]] }
 0x2cb   : > { %s1661_s1 = sld [smem:[#allocation21_spill]]  ;;  %s1662_s21 = smov %s1329_s22 }
 0x2cc   : > { %s1664_s24 = smov %s1341_s25 }
 0x2cd   :  { %31 = sbr.rel (!%p29_p13) target bundleno = 14 (0xe), region = 146 }
 0x2cf   : > { %s1663_s22 = smov %s1659_s10 }
 0x2d1   : > { %s1665_s25 = smov %s1661_s1 }
 0x2d2   :  { %771 = vsyncpa [#allocation4], 1 }
 0x2d3   :  { %773 = vsyncpa [#allocation4 + $0x1], 1 }
 0x2d4   :  { %774 = vsyncpa [#allocation7], 1 }
 0x2d5   :  { %776 = vsyncpa [#allocation7 + $0x1], 1 }
 0x2d6   :  { %777 = vsyncpa [#allocation10], 1 }
 0x2d7   :  { %779 = vsyncpa [#allocation10 + $0x1], 1 }
 0x2d8   :  { %780 = vsyncpa [#allocation5], 1 }
 0x2d9   :  { %782 = vsyncpa [#allocation5 + $0x1], 1 }
 0x2da   :  { %783 = vsyncpa [#allocation13], 1 }
 0x2db   :  { %785 = vsyncpa [#allocation13 + $0x1], 1 }

</bundles_post_ra>
